<compile_context>
chip_gen: v7x
topology: tpu7x:2x2x1
jax: 0.10.0
libtpu: 0.0.40
codegen_flags: <defaults>
</compile_context>

<pallas_src>
import jax
import jax.numpy as jnp
from jax.experimental import pallas as pl
from jax.experimental.pallas import tpu as pltpu


LANE = 128  # TPU lane width; only the output (class) dim is padded to this.


def _round_up(n, m):
    return ((n + m - 1) // m) * m


def mlp_kernel(x_ref, w1_ref, b1_ref, w2_ref, b2_ref, o_ref):
    # Fused: (x @ w1 + b1).relu() @ w2 + b2
    # MXU in bf16 with f32 accumulation; bias/ReLU on the f32 accumulator.
    x = x_ref[...].astype(jnp.bfloat16)                          # (tb, D)
    h = jnp.dot(x, w1_ref[...], preferred_element_type=jnp.float32)
    h = jnp.maximum(h + b1_ref[...], 0.0)                        # f32 (tb, H)
    h = h.astype(jnp.bfloat16)                                   # MXU operand
    o = jnp.dot(h, w2_ref[...], preferred_element_type=jnp.float32)
    o = o + b2_ref[...]                                          # f32 (tb, Cp)
    o_ref[...] = o.astype(o_ref.dtype)


def prepare_params(w1, b1, w2, b2):
    """One-time param prep: bf16 weights at rest; pad only the class dim to 128.

    w1: (D, H), b1: (H,), w2: (H, C), b2: (C,). Contraction dims D, H are kept
    unpadded (legal MXU K); C is zero-padded to a multiple of 128 so the
    output store is lane-dense/unmasked. Zero padding is exact.
    """
    D, H = w1.shape
    H2, C = w2.shape
    assert H2 == H
    Cp = _round_up(C, LANE)

    w1p = w1.astype(jnp.bfloat16)                                        # (D, H)
    b1p = b1.reshape(1, H).astype(jnp.float32)                           # (1, H)
    w2p = jnp.zeros((H, Cp), jnp.bfloat16).at[:, :C].set(
        w2.astype(jnp.bfloat16))                                         # (H, Cp)
    b2p = jnp.zeros((1, Cp), jnp.float32).at[:, :C].set(
        b2.reshape(1, C).astype(jnp.float32))                            # (1, Cp)
    return w1p, b1p, w2p, b2p


def word_classifier_forward(x, w1p, b1p, w2p, b2p, num_classes, *, tb=None):
    """Forward pass. x: (B, D) f32 (or bf16). Returns (B, num_classes) f32."""
    B, D = x.shape
    D1, H = w1p.shape
    Cp = w2p.shape[1]
    assert D1 == D

    if tb is None:
        # Whole batch in one grid step when it easily fits in VMEM (removes
        # per-step pipeline overhead, no batch padding needed). For larger
        # batches tile at 256 rows: fills the 256x256 MXU on v6e/v7x and is
        # harmless on v5e (its 128x128 MXUs are saturated at 128 rows).
        tb = B if B <= 512 else 256
    assert tb == B or tb % 16 == 0, "batch tile must be 16-aligned (bf16 sublanes)"

    if B % tb == 0:
        xp, Bp = x, B                     # no wrapper copy at all
    else:
        Bp = _round_up(B, tb)             # rare path: pad batch with zero rows
        xp = jnp.zeros((Bp, D), x.dtype).at[:B, :].set(x)

    grid = (Bp // tb,)

    flops = 2 * Bp * (D * H + H * Cp)
    bytes_accessed = (Bp * D * xp.dtype.itemsize          # x
                      + D * H * 2 + H * 4                 # w1 (bf16), b1 (f32)
                      + H * Cp * 2 + Cp * 4               # w2 (bf16), b2 (f32)
                      + Bp * Cp * 4)                      # out (f32)

    out = pl.pallas_call(
        mlp_kernel,
        out_shape=jax.ShapeDtypeStruct((Bp, Cp), jnp.float32),
        grid=grid,
        in_specs=[
            # x streams over the batch grid (block last dim == full D,
            # so the (8,128) rule is satisfied without padding D).
            pl.BlockSpec((tb, D), lambda i: (i, 0)),
            # Weights / biases: constant block index -> DMA'd once, VMEM-resident.
            pl.BlockSpec((D, H), lambda i: (0, 0)),
            pl.BlockSpec((1, H), lambda i: (0, 0)),
            pl.BlockSpec((H, Cp), lambda i: (0, 0)),
            pl.BlockSpec((1, Cp), lambda i: (0, 0)),
        ],
        # Lane-dense output slab (Cp multiple of 128): unmasked stores.
        out_specs=pl.BlockSpec((tb, Cp), lambda i: (i, 0)),
        compiler_params=pltpu.CompilerParams(
            dimension_semantics=("parallel",)),
        cost_estimate=pl.CostEstimate(
            flops=flops, bytes_accessed=bytes_accessed, transcendentals=0),
    )(xp, w1p, b1p, w2p, b2p)

    return out[:B, :num_classes]


if __name__ == "__main__":
    # Shapes implied by the module: x: (batch, input_size).
    batch, input_size, hidden_size, num_classes = 96, 32, 64, 16

    key = jax.random.PRNGKey(0)
    kx, kw1, kb1, kw2, kb2 = jax.random.split(key, 5)

    x = jax.random.normal(kx, (batch, input_size), dtype=jnp.float32)

    # Deterministic PyTorch-Linear-style init (uniform in +-1/sqrt(fan_in)).
    lim1 = 1.0 / jnp.sqrt(input_size)
    w1 = jax.random.uniform(kw1, (input_size, hidden_size),
                            minval=-lim1, maxval=lim1, dtype=jnp.float32)
    b1 = jax.random.uniform(kb1, (hidden_size,),
                            minval=-lim1, maxval=lim1, dtype=jnp.float32)
    lim2 = 1.0 / jnp.sqrt(hidden_size)
    w2 = jax.random.uniform(kw2, (hidden_size, num_classes),
                            minval=-lim2, maxval=lim2, dtype=jnp.float32)
    b2 = jax.random.uniform(kb2, (num_classes,),
                            minval=-lim2, maxval=lim2, dtype=jnp.float32)

    # One-time param preparation (bf16 at rest, class dim padded to 128).
    w1p, b1p, w2p, b2p = prepare_params(w1, b1, w2, b2)

    out = word_classifier_forward(x, w1p, b1p, w2p, b2p, num_classes)
    out = jax.block_until_ready(out)
    assert out.shape == (batch, num_classes)

    # Precision-matched reference (same bf16 rounding of MXU operands, f32 acc).
    def bf(a):
        return a.astype(jnp.bfloat16).astype(jnp.float32)

    h_ref = jnp.maximum(bf(x) @ bf(w1) + b1[None, :], 0.0)
    ref_bf16 = bf(h_ref) @ bf(w2) + b2[None, :]
    assert jnp.allclose(out, ref_bf16, atol=1e-3, rtol=1e-3), \
        float(jnp.max(jnp.abs(out - ref_bf16)))

    # Loose semantic check against the full-f32 PyTorch-equivalent forward.
    ref_f32 = jnp.maximum(x @ w1 + b1[None, :], 0.0) @ w2 + b2[None, :]
    assert jnp.allclose(out, ref_f32, atol=5e-2, rtol=5e-2), \
        float(jnp.max(jnp.abs(out - ref_f32)))

    print("KERNEL_OK")
</pallas_src>

<mosaic_0001>
module attributes {stable_mosaic.version = 11 : i64} {
  func.func @mlp_kernel(%arg0: i32, %arg1: memref<96x32xf32, #tpu.memory_space<vmem>>, %arg2: memref<32x64xbf16, #tpu.memory_space<vmem>>, %arg3: memref<1x64xf32, #tpu.memory_space<vmem>>, %arg4: memref<64x128xbf16, #tpu.memory_space<vmem>>, %arg5: memref<1x128xf32, #tpu.memory_space<vmem>>, %arg6: memref<96x128xf32, #tpu.memory_space<vmem>>) attributes {dimension_semantics = [#tpu.dimension_semantics<parallel>], iteration_bounds = array<i64: 1>, scalar_prefetch = 0 : i64, scratch_operands = 0 : i64, tpu.core_type = #tpu.core_type<tc>, window_params = [{transform_indices = @transform_0, window_bounds = array<i64: 96, 32>}, {pipeline_mode = #tpu.pipeline_mode<synchronous>, transform_indices = @transform_1, window_bounds = array<i64: 32, 64>}, {pipeline_mode = #tpu.pipeline_mode<synchronous>, transform_indices = @transform_2, window_bounds = array<i64: 1, 64>}, {pipeline_mode = #tpu.pipeline_mode<synchronous>, transform_indices = @transform_3, window_bounds = array<i64: 64, 128>}, {pipeline_mode = #tpu.pipeline_mode<synchronous>, transform_indices = @transform_4, window_bounds = array<i64: 1, 128>}, {transform_indices = @transform_5, window_bounds = array<i64: 96, 128>}]} {
    %c0 = arith.constant 0 : index
    %c0_0 = arith.constant 0 : index
    %0 = vector.load %arg1[%c0, %c0_0] : memref<96x32xf32, #tpu.memory_space<vmem>>, vector<96x32xf32>
    %1 = arith.truncf %0 : vector<96x32xf32> to vector<96x32xbf16>
    %c0_1 = arith.constant 0 : index
    %c0_2 = arith.constant 0 : index
    %2 = vector.load %arg2[%c0_1, %c0_2] : memref<32x64xbf16, #tpu.memory_space<vmem>>, vector<32x64xbf16>
    %cst = arith.constant dense<0.000000e+00> : vector<96x64xf32>
    %3 = tpu.matmul %1, %2, %cst {dimension_numbers = #tpu.dot_dimension_numbers<[1], [0], [0], [1], [0, 0, 1, 1], [], []>} : vector<96x32xbf16>, vector<32x64xbf16>, vector<96x64xf32> -> vector<96x64xf32>
    %c0_3 = arith.constant 0 : index
    %c0_4 = arith.constant 0 : index
    %4 = vector.load %arg3[%c0_3, %c0_4] : memref<1x64xf32, #tpu.memory_space<vmem>>, vector<1x64xf32>
    %5 = vector.broadcast %4 : vector<1x64xf32> to vector<96x64xf32>
    %6 = arith.addf %3, %5 : vector<96x64xf32>
    %cst_5 = arith.constant 0.000000e+00 : f32
    %7 = vector.broadcast %cst_5 : f32 to vector<96x64xf32>
    %8 = arith.maximumf %6, %7 : vector<96x64xf32>
    %9 = arith.truncf %8 : vector<96x64xf32> to vector<96x64xbf16>
    %c0_6 = arith.constant 0 : index
    %c0_7 = arith.constant 0 : index
    %10 = vector.load %arg4[%c0_6, %c0_7] : memref<64x128xbf16, #tpu.memory_space<vmem>>, vector<64x128xbf16>
    %cst_8 = arith.constant dense<0.000000e+00> : vector<96x128xf32>
    %11 = tpu.matmul %9, %10, %cst_8 {dimension_numbers = #tpu.dot_dimension_numbers<[1], [0], [0], [1], [0, 0, 1, 1], [], []>} : vector<96x64xbf16>, vector<64x128xbf16>, vector<96x128xf32> -> vector<96x128xf32>
    %c0_9 = arith.constant 0 : index
    %c0_10 = arith.constant 0 : index
    %12 = vector.load %arg5[%c0_9, %c0_10] : memref<1x128xf32, #tpu.memory_space<vmem>>, vector<1x128xf32>
    %13 = vector.broadcast %12 : vector<1x128xf32> to vector<96x128xf32>
    %14 = arith.addf %11, %13 : vector<96x128xf32>
    %c0_11 = arith.constant 0 : index
    %c0_12 = arith.constant 0 : index
    %15 = vector.load %arg6[%c0_11, %c0_12] : memref<96x128xf32, #tpu.memory_space<vmem>>, vector<96x128xf32>
    tpu.vector_store %arg6[%c0_11, %c0_12], %14 {strides = array<i32>} : memref<96x128xf32, #tpu.memory_space<vmem>>, vector<96x128xf32>,
    return
  }
  func.func @transform_0(%arg0: i32) -> (i32, i32) {
    %c0_i32 = arith.constant 0 : i32
    %c0_i32_0 = arith.constant 0 : i32
    return %arg0, %c0_i32 : i32, i32
  }
  func.func @transform_1(%arg0: i32) -> (i32, i32) {
    %c0_i32 = arith.constant 0 : i32
    %c0_i32_0 = arith.constant 0 : i32
    %c0_i32_1 = arith.constant 0 : i32
    return %c0_i32, %c0_i32_0 : i32, i32
  }
  func.func @transform_2(%arg0: i32) -> (i32, i32) {
    %c0_i32 = arith.constant 0 : i32
    %c0_i32_0 = arith.constant 0 : i32
    %c0_i32_1 = arith.constant 0 : i32
    return %c0_i32, %c0_i32_0 : i32, i32
  }
  func.func @transform_3(%arg0: i32) -> (i32, i32) {
    %c0_i32 = arith.constant 0 : i32
    %c0_i32_0 = arith.constant 0 : i32
    %c0_i32_1 = arith.constant 0 : i32
    return %c0_i32, %c0_i32_0 : i32, i32
  }
  func.func @transform_4(%arg0: i32) -> (i32, i32) {
    %c0_i32 = arith.constant 0 : i32
    %c0_i32_0 = arith.constant 0 : i32
    %c0_i32_1 = arith.constant 0 : i32
    return %c0_i32, %c0_i32_0 : i32, i32
  }
  func.func @transform_5(%arg0: i32) -> (i32, i32) {
    %c0_i32 = arith.constant 0 : i32
    %c0_i32_0 = arith.constant 0 : i32
    return %arg0, %c0_i32 : i32, i32
  }
}

</mosaic_0001>

<bundles_post_ra>
// kernel: tpu_custom_call.1
= control target key start
LH: loop header
LB: loop body
LE: loop exit
PB: predicated region body
PF: predicated region fallthrough
CT: control target
= control target key end

     0   :  { %vm63_vm0 = vcmask 261120   ;;  %s572_s0 = inlined_call_operand.vmem [shape: f32[96,32], index: 0, kind: input, shape index: {}]   ;;  %s573_s1 = inlined_call_operand.vmem [shape: bf16[32,64], index: 1, kind: input, shape index: {}]   ;;  %s574_s2 = inlined_call_operand.vmem [shape: f32[1,64], index: 2, kind: input, shape index: {}]   ;;  %s575_s3 = inlined_call_operand.vmem [shape: bf16[64,128], index: 3, kind: input, shape index: {}]   ;;  %s576_s4 = inlined_call_operand.vmem [shape: f32[1,128], index: 4, kind: input, shape index: {}]   ;;  %s577_s5 = inlined_call_operand.hbm [shape: f32[96,128], index: 5, kind: output, shape index: {}]  }
   0x1   :  { %v425_v0 = vld [vmem:[%s573_s1] sm:$0xff]   ;;  %v426_v1 = vld [vmem:[%s573_s1 + $0x8] sm:$0xff]   ;;  %v24_v5 = vld [vmem:[%s572_s0 + $0x10] sm:$0xff] }
   0x2   :  { %386 = vmatprep.subr.bf16.mxu0 %v425_v0  ;;  %v22_v2 = vld [vmem:[%s572_s0] sm:$0xff]  ;;  %v23_v3 = vld [vmem:[%s572_s0 + $0x8] sm:$0xff]  ;;  %v25_v6 = vld [vmem:[%s572_s0 + $0x18] sm:$0xff] }
   0x3   :  { %387 = vmatpush3.bf16.msra.mxu0 %v425_v0  ;;  %v34_v4 = vpack.c.bf16 %v23_v3, %v22_v2  ;;  %v26_v7 = vld [vmem:[%s572_s0 + $0x20] sm:$0xff]  ;;  %v27_v8 = vld [vmem:[%s572_s0 + $0x28] sm:$0xff]  ;;  %v35_v9 = vpack.c.bf16 %v25_v6, %v24_v5 }
   0x4   :  { %388 = vmatprep.subr.bf16.mxu0 %v426_v1  ;;  %v427_v10 = vld [vmem:[%s575_s3] sm:$0xff]   ;;  %v36_v11 = vpack.c.bf16 %v27_v8, %v26_v7  ;;  %v428_v12 = vld [vmem:[%s575_s3 + $0x8] sm:$0xff]  }
   0x5   :  { %390 = vmatprep.mubr.msk.bf16.mxu0 %vm63_vm0, %v34_v4  ;;  %402 = vmatprep.subr.bf16.mxu1 %v427_v10 }
   0x6   :  { %403 = vmatpush3.bf16.msra.mxu1 %v427_v10 }
   0x7   :  { %389 = vmatpush3.bf16.msra.mxu0 %v426_v1 }
   0x8   :  { %10 = vsyncpa [#allocation3], 0  ;;  %404 = vmatprep.subr.bf16.mxu1 %v428_v12  ;;  %v28_v13 = vld [vmem:[%s572_s0 + $0x30] sm:$0xff]  ;;  %v29_v14 = vld [vmem:[%s572_s0 + $0x38] sm:$0xff]  ;;  %vm220_vm1 = vcmask 523264  }
   0x9   :  { %v30_v15 = vld [vmem:[%s572_s0 + $0x40] sm:$0xff]  ;;  %v31_v16 = vld [vmem:[%s572_s0 + $0x48] sm:$0xff]  ;;  %v37_v17 = vpack.c.bf16 %v29_v14, %v28_v13  ;;  %v32_v19 = vld [vmem:[%s572_s0 + $0x50] sm:$0xff] }
   0xa   :  { %391 = vmatmul.mubr.msk.bf16.vlgmr.msra.gmra.mrb[0].mxu0 %vm63_vm0, %v35_v9  ;;  %405 = vmatpush3.bf16.msra.mxu1 %v428_v12  ;;  %v38_v18 = vpack.c.bf16 %v31_v16, %v30_v15  ;;  %v33_v20 = vld [vmem:[%s572_s0 + $0x58] sm:$0xff]  ;;  %v429_v22 = vld [vmem:[%s575_s3 + $0x10] sm:$0xff]   ;;  %v348_v24 = vld [vmem:[%s574_s2] ss:$0 sm:$0xff] }
   0xb   :  { %394 = vmatprep.mubr.msk.bf16.mxu0 %vm63_vm0, %v36_v11  ;;  %v39_v21 = vpack.c.bf16 %v33_v20, %v32_v19  ;;  %406 = vmatprep.subr.bf16.mxu1 %v429_v22  ;;  %v430_v23 = vld [vmem:[%s575_s3 + $0x18] sm:$0xff]   ;;  %v357_v3 = vld [vmem:[%s576_s4] ss:$0 sm:$0xff]  ;;  %s455_s3 = smov [#allocation2]  }
   0xc   :  { %s337_s4 = sshll.u32 %s455_s3, 4  ;;  %s338_s4 = int_to_ptr.vmem [resolvable:$true] %s337_s4 }
   0xd   :  { %s431_s1 = scalar_lea.vmem %s338_s4, 1536  ;;  %p436_p1 = scmp.lt.s32.totalorder %s338_s4, %s338_s4 }
   0xe   :  { %407 = vmatpush3.bf16.msra.mxu1 %v429_v22  ;;  %p432_p0 = scmp.ne.s32.totalorder %s338_s4, %s431_s1  ;;  %p437_p2 = scmp.lt.s32.totalorder %s431_s1, %s431_s1 }
   0xf   :  { %408 = vmatprep.subr.bf16.mxu1 %v430_v23 }
  0x10   :  { %p438_p3 = por %p437_p2, %p436_p1 }
  0x12   :  { %395 = vmatmul.mubr.msk.bf16.gmra.mrb[4].mxu0 %vm63_vm0, %v37_v17  ;;  %409 = vmatpush3.bf16.msra.mxu1 %v430_v23  ;;  %p439_p4 = pnand %p438_p3, %p432_p0 }
  0x13   :  { %398 = vmatprep.mubr.msk.bf16.mxu0 %vm63_vm0, %v38_v18 }
  0x1a   :  { %399 = vmatmul.mubr.msk.bf16.gmra.mrb[8].mxu0 %vm63_vm0, %v39_v21 }
  0xdd   :  { %v392_v25 = vpop.f32.mrb[0].mxu0 }
  0xde   :  { %v125_v26 = vadd.f32 %v392_v25, %v348_v24  ;;  %v116_v27 = vpop.f32.mrb[1].mxu0 }
  0xdf   :  { %v117_v28 = vadd.f32 %v348_v24, %v116_v27  ;;  %v393_v29 = vpop.f32.mrb[2].mxu0 }
  0xe0   :  { %v128_v30 = vadd.f32 %v393_v29, %v348_v24  ;;  %v119_v31 = vpop.f32.mrb[3].mxu0  ;;  %v165_v33 = vmax.f32 %v125_v26, 0.0 }
  0xe1   :  { %v120_v32 = vadd.f32 %v348_v24, %v119_v31  ;;  %v163_v35 = vmax.f32 %v117_v28, 0.0 }
  0xe2   :  { %v166_v34 = vmax.f32 %v128_v30, 0.0 }
  0xe3   :  { %v164_v36 = vmax.f32 %v120_v32, 0.0 }
  0xe4   :  { %v176_v37 = vpack.c.bf16 %v166_v34, %v165_v33 }
  0xe5   :  { %v396_v38 = vpop.f32.mrb[4].mxu0  ;;  %v175_v39 = vpack.c.bf16 %v164_v36, %v163_v35 }
  0xe6   :  { %v141_v40 = vadd.f32 %v396_v38, %v348_v24  ;;  %v132_v41 = vpop.f32.mrb[5].mxu0 }
  0xe7   :  { %v133_v42 = vadd.f32 %v348_v24, %v132_v41  ;;  %v397_v43 = vpop.f32.mrb[6].mxu0  ;;  %410 = vmatprep.mubr.msk.bf16.mxu1 %vm220_vm1, %v175_v39 }
  0xe8   :  { %v144_v44 = vadd.f32 %v397_v43, %v348_v24  ;;  %v135_v45 = vpop.f32.mrb[7].mxu0  ;;  %411 = vmatmul.mubr.msk.bf16.vlgmr.msra.gmra.mrb[0].mxu1 %vm220_vm1, %v176_v37  ;;  %v169_v47 = vmax.f32 %v141_v40, 0.0 }
  0xe9   :  { %v136_v46 = vadd.f32 %v348_v24, %v135_v45  ;;  %v167_v49 = vmax.f32 %v133_v42, 0.0 }
  0xea   :  { %v170_v48 = vmax.f32 %v144_v44, 0.0 }
  0xeb   :  { %v168_v50 = vmax.f32 %v136_v46, 0.0 }
  0xec   :  { %v178_v51 = vpack.c.bf16 %v170_v48, %v169_v47 }
  0xed   :  { %v177_v52 = vpack.c.bf16 %v168_v50, %v167_v49  ;;  %v400_v53 = vpop.f32.mrb[8].mxu0 }
  0xee   :  { %v157_v54 = vadd.f32 %v400_v53, %v348_v24  ;;  %v148_v55 = vpop.f32.mrb[9].mxu0 }
  0xef   :  { %v149_v56 = vadd.f32 %v348_v24, %v148_v55  ;;  %v401_v57 = vpop.f32.mrb[10].mxu0  ;;  %414 = vmatprep.mubr.msk.bf16.mxu1 %vm220_vm1, %v177_v52 }
  0xf0   :  { %v160_v58 = vadd.f32 %v401_v57, %v348_v24  ;;  %v151_v59 = vpop.f32.mrb[11].mxu0  ;;  %415 = vmatmul.mubr.msk.bf16.gmra.mrb[4].mxu1 %vm220_vm1, %v178_v51  ;;  %v173_v61 = vmax.f32 %v157_v54, 0.0 }
  0xf1   :  { %v152_v60 = vadd.f32 %v348_v24, %v151_v59  ;;  %v171_v63 = vmax.f32 %v149_v56, 0.0 }
  0xf2   :  { %v174_v62 = vmax.f32 %v160_v58, 0.0 }
  0xf3   :  { %v172_v0 = vmax.f32 %v152_v60, 0.0 }
  0xf4   :  { %v180_v1 = vpack.c.bf16 %v174_v62, %v173_v61 }
  0xf5   :  { %v179_v2 = vpack.c.bf16 %v172_v0, %v171_v63 }
  0xf7   :  { %418 = vmatprep.mubr.msk.bf16.mxu1 %vm220_vm1, %v179_v2 }
  0xf8   :  { %419 = vmatmul.mubr.msk.bf16.gmra.mrb[8].mxu1 %vm220_vm1, %v180_v1 }
 0x1bb   :  { %v412_v4 = vpop.f32.mrb[0].mxu1 }
 0x1bc   :  { %v282_v5 = vadd.f32 %v412_v4, %v357_v3  ;;  %v273_v6 = vpop.f32.mrb[1].mxu1 }
 0x1bd   :  { %v274_v7 = vadd.f32 %v357_v3, %v273_v6  ;;  %v413_v8 = vpop.f32.mrb[2].mxu1 }
 0x1be   :  { %322 = vst [vmem:[#allocation2 + $0x10] sm:$0xff] %v282_v5  ;;  %v285_v9 = vadd.f32 %v413_v8, %v357_v3  ;;  %v276_v10 = vpop.f32.mrb[3].mxu1 }
 0x1bf   :  { %320 = vst [vmem:[#allocation2] sm:$0xff] %v274_v7  ;;  %v277_v11 = vadd.f32 %v357_v3, %v276_v10 }
 0x1c0   :  { %323 = vst [vmem:[#allocation2 + $0x18] sm:$0xff] %v285_v9 }
 0x1c1   :  { %321 = vst [vmem:[#allocation2 + $0x8] sm:$0xff] %v277_v11 }
 0x1c3   :  { %v416_v12 = vpop.f32.mrb[4].mxu1 }
 0x1c4   :  { %v298_v13 = vadd.f32 %v416_v12, %v357_v3  ;;  %v289_v14 = vpop.f32.mrb[5].mxu1 }
 0x1c5   :  { %v290_v15 = vadd.f32 %v357_v3, %v289_v14  ;;  %v417_v16 = vpop.f32.mrb[6].mxu1 }
 0x1c6   :  { %326 = vst [vmem:[#allocation2 + $0x30] sm:$0xff] %v298_v13  ;;  %v301_v17 = vadd.f32 %v417_v16, %v357_v3  ;;  %v292_v18 = vpop.f32.mrb[7].mxu1 }
 0x1c7   :  { %324 = vst [vmem:[#allocation2 + $0x20] sm:$0xff] %v290_v15  ;;  %v293_v19 = vadd.f32 %v357_v3, %v292_v18 }
 0x1c8   :  { %327 = vst [vmem:[#allocation2 + $0x38] sm:$0xff] %v301_v17 }
 0x1c9   :  { %325 = vst [vmem:[#allocation2 + $0x28] sm:$0xff] %v293_v19 }
 0x1cb   :  { %v420_v20 = vpop.f32.mrb[8].mxu1 }
 0x1cc   :  { %v314_v21 = vadd.f32 %v420_v20, %v357_v3  ;;  %v305_v22 = vpop.f32.mrb[9].mxu1 }
 0x1cd   :  { %v306_v23 = vadd.f32 %v357_v3, %v305_v22  ;;  %v421_v24 = vpop.f32.mrb[10].mxu1 }
 0x1ce   :  { %330 = vst [vmem:[#allocation2 + $0x50] sm:$0xff] %v314_v21  ;;  %v317_v25 = vadd.f32 %v421_v24, %v357_v3  ;;  %v308_v26 = vpop.f32.mrb[11].mxu1 }
 0x1cf   :  { %328 = vst [vmem:[#allocation2 + $0x40] sm:$0xff] %v306_v23  ;;  %v309_v27 = vadd.f32 %v357_v3, %v308_v26 }
 0x1d0   :  { %331 = vst [vmem:[#allocation2 + $0x58] sm:$0xff] %v317_v25 }
 0x1d1   :  { %329 = vst [vmem:[#allocation2 + $0x48] sm:$0xff] %v309_v27 }
 0x1d2   :  { %442 = shalt.err (!%p439_p4)
}
 0x1d3   :  { %s443_s7 = scalar_lea.hbm %s577_s5, 1536 }
 0x1d4   :  { %p444_p5 = scmp.ne.s32.totalorder %s577_s5, %s443_s7  ;;  %p447_p6 = scmp.lt.u32.totalorder %s443_s7, %s577_s5 }
 0x1d6   :  { %p449_p7 = pnand %p447_p6, %p444_p5 }
 0x1d8   :  { %452 = shalt.err (!%p449_p7)
}
 0x1d9   :  { %s456_s12 = smov 128   ;;  %s457_s13 = smov 8  }
 0x1da   :  { %343 = dma.vmem_to_hbm [thread:$0]  %s338_s4, 1536, %s577_s5, [#allocation3], %s456_s12, %s456_s12, %s457_s13  }
 0x1db   :  { %453 = dma.done.wait [#allocation3], 1536  }
 0x1dc   :  { %454 = vsyncadd [#allocation3], 4294965760 }
 0x1dd   :  { %347 = vsyncpa [#allocation3], 1 }

</bundles_post_ra>
